<compile_context>
chip_gen: v5e
topology: v5e:2x2
jax: 0.10.0
libtpu: 0.0.40
codegen_flags: <defaults>
</compile_context>

<pallas_src>
import jax
import jax.numpy as jnp
from jax.experimental import pallas as pl
from jax.experimental.pallas import tpu as pltpu

NUM_CLASSES = 10      # TrainConfig.num_classes (synthetic choice)
NPAD = 128            # lane-dense padding of the class dimension
S2 = 36               # conv2 output spatial positions (6*6)
K1 = 81               # conv1 contraction: 9 conv2-taps * 9 conv1-taps
K2 = 144              # conv2 contraction: 9 taps * 16 channels
KL = 1152             # linear contraction: 36 * 32


def _conv_kernel(g_ref, w1b_ref, b1r_ref, w2_ref, b2_ref, o_ref):
    """Fused conv1+conv2 for one tile of (batch*spatial) patch rows.

    g_ref  : (R, 81)   bf16  conv2-ordered conv1 patches
                             (row = b*36 + h*6 + w, lane = (3i+j)*9 + 3di+dj)
    w1b_ref: (81, 144) bf16  block-diag conv1 weight (9 copies of the (9,16) taps)
    b1r_ref: (1, 144)  f32   conv1 bias tiled over the 9 conv2 taps
    w2_ref : (144, 32) bf16  conv2 weight, row = (3i+j)*16 + cin, lane = cout
    b2_ref : (1, 32)   f32   conv2 bias
    o_ref  : (R, 32)   bf16  conv2 activations (row = b*36 + h*6 + w, lane = cout)
    """
    # conv1, evaluated directly in conv2-im2col layout: one MXU GEMM, K=81.
    p2 = jnp.dot(g_ref[...], w1b_ref[...], preferred_element_type=jnp.float32)
    p2 = p2 + b1r_ref[...]
    # conv2: one MXU GEMM over all taps*channels at once, K=144 (f32 accumulate).
    out2 = jnp.dot(p2.astype(jnp.bfloat16), w2_ref[...],
                   preferred_element_type=jnp.float32)
    o_ref[...] = (out2 + b2_ref[...]).astype(o_ref.dtype)


def _linear_kernel(x_ref, w3_ref, b3_ref, o_ref):
    """Final linear layer: one (TB, 1152) @ (1152, 128) GEMM, lane-dense output."""
    o_ref[...] = (jnp.dot(x_ref[...], w3_ref[...],
                          preferred_element_type=jnp.float32) + b3_ref[...])


def _conv2_ordered_conv1_patches(x_nchw):
    """g[b*36 + h*6 + w, (3i+j)*9 + 3di+dj] = x[b, 0, 4h+2i+di, 4w+2j+dj]."""
    B = x_nchw.shape[0]
    x2 = x_nchw[:, 0]                                              # (B, 28, 28)
    idx = (4 * jnp.arange(6))[:, None, None] \
        + (2 * jnp.arange(3))[None, :, None] \
        + jnp.arange(3)[None, None, :]                             # (6, 3, 3)
    rows = idx[:, None, :, None, :, None]                          # h, i, di
    cols = idx[None, :, None, :, None, :]                          # w, j, dj
    g = x2[:, rows, cols]                                          # (B,6,6,3,3,3,3)
    return g.reshape(B * S2, K1)


def simple_conv_forward(params, x_nchw):
    """Forward pass matching PyTorch SimpleConv (input (B, 1, 28, 28) NCHW)."""
    B = x_nchw.shape[0]

    # ---- weight/layout prep (pure XLA, tiny) -----------------------------------
    w1m = jnp.transpose(params["w1"], (2, 3, 1, 0)).reshape(9, 16)        # (9,16)
    w1blk = (jnp.eye(9, dtype=w1m.dtype)[:, None, :, None]
             * w1m[None, :, None, :]).reshape(K1, K2).astype(jnp.bfloat16)
    b1r = jnp.tile(params["b1"], 9).reshape(1, K2).astype(jnp.float32)
    w2m = jnp.transpose(params["w2"], (2, 3, 1, 0)).reshape(K2, 32).astype(jnp.bfloat16)
    b2r = params["b2"].reshape(1, 32).astype(jnp.float32)
    # linear weight permuted so row = (h*6+w)*32 + cout matches torch.flatten on NCHW
    # (torch index m = cout*36 + h*6 + w); classes padded to a lane-dense 128.
    w3r = jnp.transpose(params["w3"].reshape(NUM_CLASSES, 32, S2),
                        (2, 1, 0)).reshape(KL, NUM_CLASSES)
    w3p = jnp.pad(w3r, ((0, 0), (0, NPAD - NUM_CLASSES))).astype(jnp.bfloat16)
    b3p = jnp.pad(params["b3"], (0, NPAD - NUM_CLASSES)).reshape(1, NPAD).astype(jnp.float32)

    # ---- input prep: conv2-ordered conv1 im2col (bf16, ~3.7x raw input bytes) ----
    g = _conv2_ordered_conv1_patches(x_nchw).astype(jnp.bfloat16)

    # ---- kernel 1: fused conv1+conv2, grid over row tiles ------------------------
    total_rows = B * S2
    if total_rows <= 576:                       # small batch: single grid step
        row_tile, padded_rows = total_rows, total_rows
    else:                                       # 8 samples (288 rows) per grid step
        row_tile = 288
        padded_rows = -(-total_rows // row_tile) * row_tile
        g = jnp.pad(g, ((0, padded_rows - total_rows), (0, 0)))

    out2 = pl.pallas_call(
        _conv_kernel,
        out_shape=jax.ShapeDtypeStruct((padded_rows, 32), jnp.bfloat16),
        grid=(padded_rows // row_tile,),
        in_specs=[
            pl.BlockSpec((row_tile, K1), lambda i: (i, 0)),
            pl.BlockSpec((K1, K2), lambda i: (0, 0)),
            pl.BlockSpec((1, K2), lambda i: (0, 0)),
            pl.BlockSpec((K2, 32), lambda i: (0, 0)),
            pl.BlockSpec((1, 32), lambda i: (0, 0)),
        ],
        out_specs=pl.BlockSpec((row_tile, 32), lambda i: (i, 0)),
        compiler_params=pltpu.CompilerParams(dimension_semantics=("parallel",)),
    )(g, w1blk, b1r, w2m, b2r)

    # torch.flatten: row-major (B*36, 32) -> (B, 1152) is a free HBM reshape.
    out2_flat = out2[:total_rows].reshape(B, KL)

    # ---- kernel 2: linear, grid over batch tiles, lane-dense output --------------
    if B <= 256:
        batch_tile, padded_b = B, B
    else:
        batch_tile = 256
        padded_b = -(-B // batch_tile) * batch_tile
        out2_flat = jnp.pad(out2_flat, ((0, padded_b - B), (0, 0)))

    logits = pl.pallas_call(
        _linear_kernel,
        out_shape=jax.ShapeDtypeStruct((padded_b, NPAD), jnp.float32),
        grid=(padded_b // batch_tile,),
        in_specs=[
            pl.BlockSpec((batch_tile, KL), lambda i: (i, 0)),
            pl.BlockSpec((KL, NPAD), lambda i: (0, 0)),
            pl.BlockSpec((1, NPAD), lambda i: (0, 0)),
        ],
        out_specs=pl.BlockSpec((batch_tile, NPAD), lambda i: (i, 0)),
        compiler_params=pltpu.CompilerParams(dimension_semantics=("parallel",)),
    )(out2_flat, w3p, b3p)

    return logits[:B, :NUM_CLASSES]


def init_params(key):
    k1, k2, k3, k4, k5, k6 = jax.random.split(key, 6)
    return {
        "w1": jax.random.normal(k1, (16, 1, 3, 3), jnp.float32) * 0.1,
        "b1": jax.random.normal(k2, (16,), jnp.float32) * 0.1,
        "w2": jax.random.normal(k3, (32, 16, 3, 3), jnp.float32) * 0.05,
        "b2": jax.random.normal(k4, (32,), jnp.float32) * 0.05,
        "w3": jax.random.normal(k5, (NUM_CLASSES, 1152), jnp.float32) * 0.02,
        "b3": jax.random.normal(k6, (NUM_CLASSES,), jnp.float32) * 0.02,
    }


def reference_forward(params, x_nchw):
    """Pure-JAX (XLA) reference with the exact PyTorch semantics, for validation."""
    dn = ("NCHW", "OIHW", "NCHW")
    out = jax.lax.conv_general_dilated(
        x_nchw, params["w1"], window_strides=(2, 2), padding="VALID",
        dimension_numbers=dn) + params["b1"][None, :, None, None]
    out = jax.lax.conv_general_dilated(
        out, params["w2"], window_strides=(2, 2), padding="VALID",
        dimension_numbers=dn) + params["b2"][None, :, None, None]
    flat = out.reshape(out.shape[0], -1)          # NCHW flatten == torch.flatten
    return flat @ params["w3"].T + params["b3"]


if __name__ == "__main__":
    key = jax.random.PRNGKey(0)
    pkey, xkey = jax.random.split(key)
    params = init_params(pkey)
    # Input shape implied by Linear(1152, .): (B, 1, 28, 28)  (MNIST-like), B=2
    x = jax.random.normal(xkey, (2, 1, 28, 28), jnp.float32)

    fwd = jax.jit(simple_conv_forward)
    y = fwd(params, x)
    jax.block_until_ready(y)
    assert y.shape == (2, NUM_CLASSES) and y.dtype == jnp.float32

    # loose tolerance: all three GEMMs run in bf16 on the MXU (f32 accumulate)
    y_ref = reference_forward(params, x)
    err = float(jnp.max(jnp.abs(y - y_ref)))
    assert err < 7.5e-2, f"mismatch vs reference: max abs err = {err}"
    print("KERNEL_OK")
</pallas_src>

<mosaic_0001>
module attributes {stable_mosaic.version = 11 : i64} {
  func.func @_conv_kernel(%arg0: i32, %arg1: memref<72x81xbf16, #tpu.memory_space<vmem>>, %arg2: memref<81x144xbf16, #tpu.memory_space<vmem>>, %arg3: memref<1x144xf32, #tpu.memory_space<vmem>>, %arg4: memref<144x32xbf16, #tpu.memory_space<vmem>>, %arg5: memref<1x32xf32, #tpu.memory_space<vmem>>, %arg6: memref<72x32xbf16, #tpu.memory_space<vmem>>) attributes {dimension_semantics = [#tpu.dimension_semantics<parallel>], iteration_bounds = array<i64: 1>, scalar_prefetch = 0 : i64, scratch_operands = 0 : i64, tpu.core_type = #tpu.core_type<tc>, window_params = [{transform_indices = @transform_0, window_bounds = array<i64: 72, 81>}, {pipeline_mode = #tpu.pipeline_mode<synchronous>, transform_indices = @transform_1, window_bounds = array<i64: 81, 144>}, {pipeline_mode = #tpu.pipeline_mode<synchronous>, transform_indices = @transform_2, window_bounds = array<i64: 1, 144>}, {pipeline_mode = #tpu.pipeline_mode<synchronous>, transform_indices = @transform_3, window_bounds = array<i64: 144, 32>}, {pipeline_mode = #tpu.pipeline_mode<synchronous>, transform_indices = @transform_4, window_bounds = array<i64: 1, 32>}, {transform_indices = @transform_5, window_bounds = array<i64: 72, 32>}]} {
    %c0 = arith.constant 0 : index
    %c0_0 = arith.constant 0 : index
    %0 = vector.load %arg1[%c0, %c0_0] : memref<72x81xbf16, #tpu.memory_space<vmem>>, vector<72x81xbf16>
    %c0_1 = arith.constant 0 : index
    %c0_2 = arith.constant 0 : index
    %1 = vector.load %arg2[%c0_1, %c0_2] : memref<81x144xbf16, #tpu.memory_space<vmem>>, vector<81x144xbf16>
    %cst = arith.constant dense<0.000000e+00> : vector<72x144xf32>
    %2 = tpu.matmul %0, %1, %cst {dimension_numbers = #tpu.dot_dimension_numbers<[1], [0], [0], [1], [0, 0, 1, 1], [], []>} : vector<72x81xbf16>, vector<81x144xbf16>, vector<72x144xf32> -> vector<72x144xf32>
    %c0_3 = arith.constant 0 : index
    %c0_4 = arith.constant 0 : index
    %3 = vector.load %arg3[%c0_3, %c0_4] : memref<1x144xf32, #tpu.memory_space<vmem>>, vector<1x144xf32>
    %4 = vector.broadcast %3 : vector<1x144xf32> to vector<72x144xf32>
    %5 = arith.addf %2, %4 : vector<72x144xf32>
    %6 = arith.truncf %5 : vector<72x144xf32> to vector<72x144xbf16>
    %c0_5 = arith.constant 0 : index
    %c0_6 = arith.constant 0 : index
    %7 = vector.load %arg4[%c0_5, %c0_6] : memref<144x32xbf16, #tpu.memory_space<vmem>>, vector<144x32xbf16>
    %cst_7 = arith.constant dense<0.000000e+00> : vector<72x32xf32>
    %8 = tpu.matmul %6, %7, %cst_7 {dimension_numbers = #tpu.dot_dimension_numbers<[1], [0], [0], [1], [0, 0, 1, 1], [], []>} : vector<72x144xbf16>, vector<144x32xbf16>, vector<72x32xf32> -> vector<72x32xf32>
    %c0_8 = arith.constant 0 : index
    %c0_9 = arith.constant 0 : index
    %9 = vector.load %arg5[%c0_8, %c0_9] : memref<1x32xf32, #tpu.memory_space<vmem>>, vector<1x32xf32>
    %10 = vector.broadcast %9 : vector<1x32xf32> to vector<72x32xf32>
    %11 = arith.addf %8, %10 : vector<72x32xf32>
    %12 = arith.truncf %11 : vector<72x32xf32> to vector<72x32xbf16>
    %c0_10 = arith.constant 0 : index
    %c0_11 = arith.constant 0 : index
    %13 = vector.load %arg6[%c0_10, %c0_11] : memref<72x32xbf16, #tpu.memory_space<vmem>>, vector<72x32xbf16>
    tpu.vector_store %arg6[%c0_10, %c0_11], %12 {strides = array<i32>} : memref<72x32xbf16, #tpu.memory_space<vmem>>, vector<72x32xbf16>,
    return
  }
  func.func @transform_0(%arg0: i32) -> (i32, i32) {
    %c0_i32 = arith.constant 0 : i32
    %c0_i32_0 = arith.constant 0 : i32
    return %arg0, %c0_i32 : i32, i32
  }
  func.func @transform_1(%arg0: i32) -> (i32, i32) {
    %c0_i32 = arith.constant 0 : i32
    %c0_i32_0 = arith.constant 0 : i32
    %c0_i32_1 = arith.constant 0 : i32
    return %c0_i32, %c0_i32_0 : i32, i32
  }
  func.func @transform_2(%arg0: i32) -> (i32, i32) {
    %c0_i32 = arith.constant 0 : i32
    %c0_i32_0 = arith.constant 0 : i32
    %c0_i32_1 = arith.constant 0 : i32
    return %c0_i32, %c0_i32_0 : i32, i32
  }
  func.func @transform_3(%arg0: i32) -> (i32, i32) {
    %c0_i32 = arith.constant 0 : i32
    %c0_i32_0 = arith.constant 0 : i32
    %c0_i32_1 = arith.constant 0 : i32
    return %c0_i32, %c0_i32_0 : i32, i32
  }
  func.func @transform_4(%arg0: i32) -> (i32, i32) {
    %c0_i32 = arith.constant 0 : i32
    %c0_i32_0 = arith.constant 0 : i32
    %c0_i32_1 = arith.constant 0 : i32
    return %c0_i32, %c0_i32_0 : i32, i32
  }
  func.func @transform_5(%arg0: i32) -> (i32, i32) {
    %c0_i32 = arith.constant 0 : i32
    %c0_i32_0 = arith.constant 0 : i32
    return %arg0, %c0_i32 : i32, i32
  }
}

module attributes {stable_mosaic.version = 11 : i64} {
  func.func @_linear_kernel(%arg0: i32, %arg1: memref<2x1152xbf16, #tpu.memory_space<vmem>>, %arg2: memref<1152x128xbf16, #tpu.memory_space<vmem>>, %arg3: memref<1x128xf32, #tpu.memory_space<vmem>>, %arg4: memref<2x128xf32, #tpu.memory_space<vmem>>) attributes {dimension_semantics = [#tpu.dimension_semantics<parallel>], iteration_bounds = array<i64: 1>, scalar_prefetch = 0 : i64, scratch_operands = 0 : i64, tpu.core_type = #tpu.core_type<tc>, window_params = [{transform_indices = @transform_0, window_bounds = array<i64: 2, 1152>}, {pipeline_mode = #tpu.pipeline_mode<synchronous>, transform_indices = @transform_1, window_bounds = array<i64: 1152, 128>}, {pipeline_mode = #tpu.pipeline_mode<synchronous>, transform_indices = @transform_2, window_bounds = array<i64: 1, 128>}, {transform_indices = @transform_3, window_bounds = array<i64: 2, 128>}]} {
    %c0 = arith.constant 0 : index
    %c0_0 = arith.constant 0 : index
    %0 = vector.load %arg1[%c0, %c0_0] : memref<2x1152xbf16, #tpu.memory_space<vmem>>, vector<2x1152xbf16>
    %c0_1 = arith.constant 0 : index
    %c0_2 = arith.constant 0 : index
    %1 = vector.load %arg2[%c0_1, %c0_2] : memref<1152x128xbf16, #tpu.memory_space<vmem>>, vector<1152x128xbf16>
    %cst = arith.constant dense<0.000000e+00> : vector<2x128xf32>
    %2 = tpu.matmul %0, %1, %cst {dimension_numbers = #tpu.dot_dimension_numbers<[1], [0], [0], [1], [0, 0, 1, 1], [], []>} : vector<2x1152xbf16>, vector<1152x128xbf16>, vector<2x128xf32> -> vector<2x128xf32>
    %c0_3 = arith.constant 0 : index
    %c0_4 = arith.constant 0 : index
    %3 = vector.load %arg3[%c0_3, %c0_4] : memref<1x128xf32, #tpu.memory_space<vmem>>, vector<1x128xf32>
    %4 = vector.broadcast %3 : vector<1x128xf32> to vector<2x128xf32>
    %5 = arith.addf %2, %4 : vector<2x128xf32>
    %c0_5 = arith.constant 0 : index
    %c0_6 = arith.constant 0 : index
    %6 = vector.load %arg4[%c0_5, %c0_6] : memref<2x128xf32, #tpu.memory_space<vmem>>, vector<2x128xf32>
    tpu.vector_store %arg4[%c0_5, %c0_6], %5 {strides = array<i32>} : memref<2x128xf32, #tpu.memory_space<vmem>>, vector<2x128xf32>,
    return
  }
  func.func @transform_0(%arg0: i32) -> (i32, i32) {
    %c0_i32 = arith.constant 0 : i32
    %c0_i32_0 = arith.constant 0 : i32
    return %arg0, %c0_i32 : i32, i32
  }
  func.func @transform_1(%arg0: i32) -> (i32, i32) {
    %c0_i32 = arith.constant 0 : i32
    %c0_i32_0 = arith.constant 0 : i32
    %c0_i32_1 = arith.constant 0 : i32
    return %c0_i32, %c0_i32_0 : i32, i32
  }
  func.func @transform_2(%arg0: i32) -> (i32, i32) {
    %c0_i32 = arith.constant 0 : i32
    %c0_i32_0 = arith.constant 0 : i32
    %c0_i32_1 = arith.constant 0 : i32
    return %c0_i32, %c0_i32_0 : i32, i32
  }
  func.func @transform_3(%arg0: i32) -> (i32, i32) {
    %c0_i32 = arith.constant 0 : i32
    %c0_i32_0 = arith.constant 0 : i32
    return %arg0, %c0_i32 : i32, i32
  }
}

</mosaic_0001>

<bundles_post_ra>
// kernel: mul.13
= control target key start
LH: loop header
LB: loop body
LE: loop exit
PB: predicated region body
PF: predicated region fallthrough
CT: control target
= control target key end

     0   :  { %vm15_vm0 = vcmask 130048   ;;  %s59_s0 = inlined_call_operand.vmem [shape: f32[3,3,16], index: 0, kind: input, shape index: {}]   ;;  %s60_s1 = inlined_call_operand.vmem [shape: f32[9,16], index: 1, kind: output, shape index: {}]  }
   0x1   :  { %v27_v0 = vld [vmem:[%s59_s0 + $0x8] sm:$0xf]  ;;  %v28_v1 = vld [vmem:[%s59_s0 + $0x4] sm:$0xf]  ;;  %v12_v2 = vld [vmem:[%s59_s0] sm:$0xf] }
   0x2   :  { %7 = vst [vmem:[#allocation0] sm:$0xf] %v27_v0 }
   0x3   :  { %11 = vst [vmem:[#allocation0 + $0x10] sm:$0xf] %v28_v1 }
   0x4   :  { %13 = vst [vmem:[#allocation0 + $0x8] sm:$0xf] %v12_v2 }
   0x9   :  { %v23_v3 = vld [vmem:[#allocation0] sm:$0x7]  }
   0xa   :  { %v18_v4 = vld [vmem:[#allocation0 + $0x10] sm:$0x7]   ;;  %30 = vst.msk [vmem:[%s60_s1 + $0x6] sm:$0x7] %vm15_vm0, %v23_v3  }
   0xb   :  { %v14_v5 = vld [vmem:[#allocation0 + $0x8] sm:$0x7]   ;;  %29 = vst.msk [vmem:[%s60_s1 + $0x3] sm:$0x7] %vm15_vm0, %v18_v4  }
   0xc   :  { %16 = vst.msk [vmem:[%s60_s1] sm:$0x7] %vm15_vm0, %v14_v5  }

// kernel: tile.8
= control target key start
LH: loop header
LB: loop body
LE: loop exit
PB: predicated region body
PF: predicated region fallthrough
CT: control target
= control target key end

     0   :  { %s28_s0 = inlined_call_operand.vmem [shape: f32[16], index: 0, kind: input, shape index: {}]   ;;  %s29_s1 = inlined_call_operand.vmem [shape: f32[9,16], index: 1, kind: output, shape index: {}]  }
   0x1   :  { %v4_v0 = vld [vmem:[%s28_s0] ss:$0 sm:$0xff] }
   0x2   :  { %5 = vst [vmem:[%s29_s1] sm:$0xff] %v4_v0 }
   0x3   :  { %8 = vst [vmem:[%s29_s1 + $0x8] sm:$0xff] %v4_v0 }

// kernel: tile.9
= control target key start
LH: loop header
LB: loop body
LE: loop exit
PB: predicated region body
PF: predicated region fallthrough
CT: control target
= control target key end

     0   :  { %s75_s10 = smov 112   ;;  %s76_s11 = smov 80   ;;  %vm4_vm0 = vcmask 130048   ;;  %vm10_vm1 = vcmask 1048448   ;;  %vm16_vm2 = vcmask 917248   ;;  %vm22_vm3 = vcmask 786048   ;;  %s122_s0 = inlined_call_operand.vmem [shape: f32[9,16], index: 0, kind: input, shape index: {}]   ;;  %s123_s1 = inlined_call_operand.vmem [shape: f32[1,144], index: 1, kind: output, shape index: {}]  }
   0x1   :  { %v60_v0 = vld [vmem:[%s122_s0 + $0x7] sm:$0x1]   ;;  %v62_v1 = vld [vmem:[%s122_s0 + $0x5] sm:$0x1]   ;;  %v64_v2 = vld [vmem:[%s122_s0 + $0x3] sm:$0x1]  }
   0x2   :  { %8 = vrot.lane.b32.xlu0 %v60_v0, %s75_s10  ;;  %20 = vrot.lane.b32.xlu1 %v62_v1, %s76_s11  ;;  %s77_s14 = smov 48   ;;  %v61_v3 = vld [vmem:[%s122_s0 + $0x6] sm:$0x1]   ;;  %v63_v4 = vld [vmem:[%s122_s0 + $0x4] sm:$0x1]   ;;  %s78_s21 = smov 96  }
   0x3   :  { %32 = vrot.lane.b32.xlu2 %v64_v2, %s77_s14  ;;  %v65_v5 = vld [vmem:[%s122_s0 + $0x2] sm:$0x1]   ;;  %s79_s22 = smov 64   ;;  %s80_s23 = smov 32   ;;  %v66_v6 = vld [vmem:[%s122_s0 + $0x1] sm:$0x1]  }
   0x4   :  { %s81_s26 = smov 16   ;;  %s2_s27 = smov 3  ;;  %vm28_vm4 = vcmask 654848   ;;  %vm34_vm5 = vcmask 523648   ;;  %vm40_vm6 = vcmask 392448   ;;  %vm46_vm7 = vcmask 261248  }
   0x5   :  { %v3_v7 = vld [vmem:[%s122_s0] ss:$8 sm:%s2_s27]  }
   0x6   :  { %5 = vst.msk [vmem:[#allocation0] ss:$8 sm:$0x3] %vm4_vm0, %v3_v7  }
   0xa   :  { %14 = vrot.lane.b32.xlu0 %v61_v3, %s78_s21  ;;  %26 = vrot.lane.b32.xlu1 %v63_v4, %s79_s22 }
   0xb   :  { %38 = vrot.lane.b32.xlu2 %v65_v5, %s80_s23 }
   0xd   :  { %v55_v8 = vld [vmem:[#allocation0 + $0x8] sm:$0x1] }
   0xe   :  { %67 = vst [vmem:[%s123_s1 + $0x1] sm:$0x1] %v55_v8 }
  0x12   :  { %44 = vrot.lane.b32.xlu0 %v66_v6, %s81_s26 }
  0x5d   :  { %v33_v9 = vpop.permute.xlu2 %32  }
  0x65   :  { %v39_v10 = vpop.permute.xlu2 %38  }
  0x74   :  { %v9_v11 = vpop.permute.xlu0 %8   ;;  %v21_v12 = vpop.permute.xlu1 %20  }
  0x75   :  { %11 = vst.msk [vmem:[#allocation0] sm:$0x1] %vm10_vm1, %v9_v11  }
  0x7c   :  { %v15_v13 = vpop.permute.xlu0 %14   ;;  %v27_v14 = vpop.permute.xlu1 %26  }
  0x7d   :  { %17 = vst.msk [vmem:[#allocation0] sm:$0x1] %vm16_vm2, %v15_v13  }
  0x7e   :  { %23 = vst.msk [vmem:[#allocation0] sm:$0x1] %vm22_vm3, %v21_v12  }
  0x7f   :  { %29 = vst.msk [vmem:[#allocation0] sm:$0x1] %vm28_vm4, %v27_v14  }
  0x80   :  { %35 = vst.msk [vmem:[#allocation0] sm:$0x1] %vm34_vm5, %v33_v9  }
  0x81   :  { %41 = vst.msk [vmem:[#allocation0] sm:$0x1] %vm40_vm6, %v39_v10  }
  0x84   :  { %v45_v15 = vpop.permute.xlu0 %44  }
  0x85   :  { %47 = vst.msk [vmem:[#allocation0] sm:$0x1] %vm46_vm7, %v45_v15  }
  0x8c   :  { %v50_v16 = vld [vmem:[#allocation0] sm:$0x1] }
  0x8d   :  { %53 = vst [vmem:[%s123_s1] sm:$0x1] %v50_v16 }

// kernel: simple_conv_forward.2
= control target key start
LH: loop header
LB: loop body
LE: loop exit
PB: predicated region body
PF: predicated region fallthrough
CT: control target
= control target key end

     0   :  { %vm141_vm0 = vcmask 1040384   ;;  %v539_v3 = vmov 0   ;;  %vm125_vm1 = vcmask 662528   ;;  %vm302_vm2 = vcmask 130048   ;;  %s732_s1 = inlined_call_operand.vmem [shape: bf16[81,144], index: 1, kind: input, shape index: {}]   ;;  %s733_s0 = inlined_call_operand.vmem [shape: bf16[72,81], index: 0, kind: input, shape index: {}]   ;;  %s734_s3 = inlined_call_operand.vmem [shape: bf16[144,32], index: 3, kind: input, shape index: {}]   ;;  %s735_s4 = inlined_call_operand.vmem [shape: f32[1,32], index: 4, kind: input, shape index: {}]   ;;  %s736_s2 = inlined_call_operand.vmem [shape: f32[1,144], index: 2, kind: input, shape index: {}]   ;;  %s737_s5 = inlined_call_operand.vmem [shape: bf16[72,32], index: 5, kind: output, shape index: {}]  }
   0x1   :  { %v40_v0 = vld [vmem:[%s732_s1 + $0x50] sm:$0x11]  ;;  %v143_v4 = vsel %vm141_vm0, 65535, %v539_v3  ;;  %v457_v7 = vld [vmem:[%s732_s1 + $0x40] sm:$0xf]  ;;  %v515_v40 = vld [vmem:[%s733_s0 + $0x8] sm:$0xff] }
   0x2   :  { %v101_v1 = vunpack.c.l.b16 %v40_v0  ;;  %v102_v2 = vunpack.c.h.b16 %v40_v0  ;;  %v527_v8 = vld [vmem:[%s732_s1 + $0x44] sm:$0xf0]  ;;  %v526_v9 = vld [vmem:[%s732_s1 + $0x44] sm:$0xf]  ;;  %v459_v10 = vld [vmem:[%s732_s1 + $0x48] sm:$0xf0] }
   0x3   :  { %v458_v13 = vor.u32 %v527_v8, %v457_v7  ;;  %v462_v14 = vor.u32 %v526_v9, %v459_v10  ;;  %v449_v15 = vld [vmem:[%s732_s1 + $0x30] sm:$0xf]  ;;  %v525_v16 = vld [vmem:[%s732_s1 + $0x34] sm:$0xf0]  ;;  %v524_v17 = vld [vmem:[%s732_s1 + $0x34] sm:$0xf] }
   0x4   :  { %v113_v5 = vpack.c.b16 %v101_v1, %v101_v1  ;;  %v114_v6 = vpack.c.b16 %v102_v2, %v102_v2  ;;  %v451_v18 = vld [vmem:[%s732_s1 + $0x38] sm:$0xf0]  ;;  %v450_v19 = vor.u32 %v525_v16, %v449_v15  ;;  %v441_v21 = vld [vmem:[%s732_s1 + $0x20] sm:$0xf]  ;;  %v523_v22 = vld [vmem:[%s732_s1 + $0x24] sm:$0xf0] }
   0x5   :  { %v454_v20 = vor.u32 %v524_v17, %v451_v18  ;;  %v522_v23 = vld [vmem:[%s732_s1 + $0x24] sm:$0xf]  ;;  %v443_v24 = vld [vmem:[%s732_s1 + $0x28] sm:$0xf0]  ;;  %v442_v25 = vor.u32 %v523_v22, %v441_v21  ;;  %v433_v27 = vld [vmem:[%s732_s1 + $0x10] sm:$0xf] }
   0x6   :  { %v145_v11 = vand.u32 %v143_v4, %v113_v5  ;;  %v148_v12 = vand.u32 %v143_v4, %v114_v6  ;;  %v446_v26 = vor.u32 %v522_v23, %v443_v24  ;;  %v521_v28 = vld [vmem:[%s732_s1 + $0x14] sm:$0xf0]  ;;  %v520_v29 = vld [vmem:[%s732_s1 + $0x14] sm:$0xf]  ;;  %v435_v30 = vld [vmem:[%s732_s1 + $0x18] sm:$0xf0] }
   0x7   :  { %v434_v31 = vor.u32 %v521_v28, %v433_v27  ;;  %v438_v32 = vor.u32 %v520_v29, %v435_v30  ;;  %v425_v33 = vld [vmem:[%s732_s1] sm:$0xf]  ;;  %v519_v34 = vld [vmem:[%s732_s1 + $0x4] sm:$0xf0]  ;;  %v518_v35 = vld [vmem:[%s732_s1 + $0x4] sm:$0xf] }
   0x8   :  { %152 = vmatpush.bf16.msra.mxu0 %v145_v11  ;;  %185 = vmatpush.bf16.msra.mxu1 %v148_v12  ;;  %v427_v36 = vld [vmem:[%s732_s1 + $0x8] sm:$0xf0]  ;;  %v426_v37 = vor.u32 %v519_v34, %v425_v33  ;;  %v514_v39 = vld [vmem:[%s733_s0] sm:$0xff]  ;;  %v516_v41 = vld [vmem:[%s733_s0 + $0x10] sm:$0xff]  ;;  %vm393_vm3 = vcmask 257024  }
   0x9   :  { %v430_v38 = vor.u32 %v518_v35, %v427_v36  ;;  %v535_v42 = vld [vmem:[%s734_s3 + $0x38] sm:$0xff]  ;;  %v534_v43 = vld [vmem:[%s734_s3 + $0x30] sm:$0xff]  ;;  %v533_v44 = vld [vmem:[%s734_s3 + $0x28] sm:$0xff] }
   0xa   :  { %318 = vmatpush.bf16.msra.mxu2 %v535_v42  ;;  %v532_v45 = vld [vmem:[%s734_s3 + $0x20] sm:$0xff]  ;;  %v517_v46 = vld [vmem:[%s733_s0 + $0x18] sm:$0xff]  ;;  %v530_v51 = vld [vmem:[%s734_s3 + $0x10] sm:$0xff] }
   0xb   :  { %v531_v47 = vld [vmem:[%s734_s3 + $0x18] sm:$0xff]  ;;  %v29_v48 = vld [vmem:[%s733_s0 + $0x20] sm:$0xf]  ;;  %v529_v52 = vld [vmem:[%s734_s3 + $0x8] sm:$0xff] }
   0xc   :  { %153 = vmatpush.bf16.msra.mxu0 %v458_v13  ;;  %186 = vmatpush.bf16.msra.mxu1 %v462_v14  ;;  %v64_v49 = vunpack.c.l.b16 %v29_v48  ;;  %v528_v53 = vld [vmem:[%s734_s3] sm:$0xff] }
   0xd   :  { %v536_v54 = vld [vmem:[%s734_s3 + $0x40] sm:$0xff] }
   0xe   :  { %319 = vmatpush.bf16.msra.mxu2 %v534_v43  ;;  %v69_v50 = vpack.c.b16 %v64_v49, %v64_v49  ;;  %358 = vmatpush.bf16.msra.mxu3 %v536_v54  ;;  %v41_v57 = vld [vmem:[%s736_s2] sm:$0x3] }
   0xf   :  { %v43_v58 = vperm.slane %v41_v57, 0  ;;  %v44_v59 = vperm.slane %v41_v57, 1  ;;  %v538_v42 = vld [vmem:[%s735_s4] ss:$0 sm:$0xff] }
  0x10   :  { %154 = vmatpush.bf16.msra.mxu0 %v450_v19  ;;  %187 = vmatpush.bf16.msra.mxu1 %v454_v20 }
  0x12   :  { %320 = vmatpush.bf16.msra.mxu2 %v533_v44 }
  0x14   :  { %155 = vmatpush.bf16.msra.mxu0 %v442_v25  ;;  %188 = vmatpush.bf16.msra.mxu1 %v446_v26 }
  0x16   :  { %321 = vmatpush.bf16.msra.mxu2 %v532_v45 }
  0x18   :  { %156 = vmatpush.bf16.msra.mxu0 %v434_v31  ;;  %189 = vmatpush.bf16.msra.mxu1 %v438_v32 }
  0x1a   :  { %322 = vmatpush.bf16.msra.mxu2 %v531_v47 }
  0x1c   :  { %157 = vmatpush.bf16.msra.mxu0 %v426_v37  ;;  %190 = vmatpush.bf16.msra.mxu1 %v430_v38 }
  0x1e   :  { %323 = vmatpush.bf16.msra.mxu2 %v530_v51 }
  0x1f   :  { %463 = vmatmul.msk.bf16.vlgmr.msra.gmra.mxu0 %vm125_vm1, %v514_v39  ;;  %468 = vmatmul.msk.bf16.vlgmr.msra.gmra.mxu1 %vm125_vm1, %v514_v39 }
  0x22   :  { %324 = vmatpush.bf16.msra.mxu2 %v529_v52 }
  0x26   :  { %325 = vmatpush.bf16.msra.mxu2 %v528_v53 }
  0x2f   :  { %464 = vmatmul.msk.bf16.gmra.mxu0 %vm125_vm1, %v515_v40  ;;  %469 = vmatmul.msk.bf16.gmra.mxu1 %vm125_vm1, %v515_v40 }
  0x3f   :  { %465 = vmatmul.msk.bf16.gmra.mxu0 %vm125_vm1, %v516_v41  ;;  %470 = vmatmul.msk.bf16.gmra.mxu1 %vm125_vm1, %v516_v41 }
  0x4f   :  { %466 = vmatmul.msk.bf16.gmra.mxu0 %vm125_vm1, %v517_v46  ;;  %471 = vmatmul.msk.bf16.gmra.mxu1 %vm125_vm1, %v517_v46 }
  0x5f   :  { %467 = vmatmul.msk.bf16.gmra.mxu0 %vm125_vm1, %v69_v50  ;;  %472 = vmatmul.msk.bf16.gmra.mxu1 %vm125_vm1, %v69_v50 }
  0x9c   :  { %v159_v55 = vpop.f32.mrf.mxu0  ;;  %v192_v56 = vpop.f32.mrf.mxu1 }
  0x9d   :  { %v160_v62 = vadd.f32 %v159_v55, %v43_v58  ;;  %v193_v63 = vadd.f32 %v192_v56, %v44_v59 }
  0xa4   :  { %v161_v60 = vpop.f32.mrf.mxu0  ;;  %v194_v61 = vpop.f32.mrf.mxu1 }
  0xa5   :  { %v162_v0 = vadd.f32 %v161_v60, %v43_v58  ;;  %v195_v1 = vadd.f32 %v194_v61, %v44_v59 }
  0xa7   :  { %v217_v2 = vpack.c.bf16 %v195_v1, %v193_v63  ;;  %v216_v3 = vpack.c.bf16 %v162_v0, %v160_v62 }
  0xa9   :  { %326 = vmatmul.bf16.vlgmr.msra.gmra.mxu2 %v216_v3  ;;  %509 = vmatmul.msk.bf16.vlgmr.msra.gmra.mxu3 %vm302_vm2, %v217_v2 }
  0xac   :  { %v164_v4 = vpop.f32.mrf.mxu0  ;;  %v197_v5 = vpop.f32.mrf.mxu1 }
  0xad   :  { %v165_v8 = vadd.f32 %v164_v4, %v43_v58  ;;  %v198_v9 = vadd.f32 %v197_v5, %v44_v59 }
  0xb4   :  { %v166_v6 = vpop.f32.mrf.mxu0  ;;  %v199_v7 = vpop.f32.mrf.mxu1 }
  0xb5   :  { %v167_v10 = vadd.f32 %v166_v6, %v43_v58  ;;  %v200_v11 = vadd.f32 %v199_v7, %v44_v59 }
  0xb7   :  { %v219_v12 = vpack.c.bf16 %v200_v11, %v198_v9  ;;  %v218_v13 = vpack.c.bf16 %v167_v10, %v165_v8 }
  0xb9   :  { %331 = vmatmul.bf16.gmra.mxu2 %v218_v13  ;;  %510 = vmatmul.msk.bf16.gmra.mxu3 %vm302_vm2, %v219_v12 }
  0xbc   :  { %v169_v14 = vpop.f32.mrf.mxu0  ;;  %v202_v15 = vpop.f32.mrf.mxu1 }
  0xbd   :  { %v170_v18 = vadd.f32 %v169_v14, %v43_v58  ;;  %v203_v19 = vadd.f32 %v202_v15, %v44_v59 }
  0xc4   :  { %v171_v16 = vpop.f32.mrf.mxu0  ;;  %v204_v17 = vpop.f32.mrf.mxu1 }
  0xc5   :  { %v172_v20 = vadd.f32 %v171_v16, %v43_v58  ;;  %v205_v21 = vadd.f32 %v204_v17, %v44_v59 }
  0xc7   :  { %v221_v22 = vpack.c.bf16 %v205_v21, %v203_v19  ;;  %v220_v23 = vpack.c.bf16 %v172_v20, %v170_v18 }
  0xc9   :  { %336 = vmatmul.bf16.gmra.mxu2 %v220_v23  ;;  %511 = vmatmul.msk.bf16.gmra.mxu3 %vm302_vm2, %v221_v22 }
  0xcc   :  { %v174_v24 = vpop.f32.mrf.mxu0  ;;  %v207_v25 = vpop.f32.mrf.mxu1 }
  0xcd   :  { %v175_v28 = vadd.f32 %v174_v24, %v43_v58  ;;  %v208_v29 = vadd.f32 %v207_v25, %v44_v59 }
  0xd4   :  { %v176_v26 = vpop.f32.mrf.mxu0  ;;  %v209_v27 = vpop.f32.mrf.mxu1 }
  0xd5   :  { %v177_v30 = vadd.f32 %v176_v26, %v43_v58  ;;  %v210_v31 = vadd.f32 %v209_v27, %v44_v59 }
  0xd7   :  { %v223_v32 = vpack.c.bf16 %v210_v31, %v208_v29  ;;  %v222_v33 = vpack.c.bf16 %v177_v30, %v175_v28 }
  0xd9   :  { %341 = vmatmul.bf16.gmra.mxu2 %v222_v33  ;;  %512 = vmatmul.msk.bf16.gmra.mxu3 %vm302_vm2, %v223_v32 }
  0xdc   :  { %v179_v34 = vpop.f32.mrf.mxu0  ;;  %v212_v35 = vpop.f32.mrf.mxu1 }
  0xdd   :  { %v180_v36 = vadd.f32 %v179_v34, %v43_v58  ;;  %v213_v37 = vadd.f32 %v212_v35, %v44_v59 }
  0xdf   :  { %v224_v40 = vpack.c.bf16 %v180_v36, %v180_v36  ;;  %v225_v41 = vpack.c.bf16 %v213_v37, %v213_v37 }
  0xe4   :  { %v181_v38 = vpop.f32.mrf.mxu0  ;;  %v214_v39 = vpop.f32.mrf.mxu1 }
  0xe9   :  { %346 = vmatmul.bf16.gmra.mxu2 %v224_v40  ;;  %513 = vmatmul.msk.bf16.gmra.mxu3 %vm302_vm2, %v225_v41 }
 0x12c   :  { %v327_v43 = vpop.f32.mrf.mxu2  ;;  %v360_v44 = vpop.f32.mrf.mxu3 }
 0x12d   :  { %v328_v45 = vadd.f32 %v538_v42, %v327_v43 }
 0x12f   :  { %v361_v46 = vadd.f32 %v360_v44, %v328_v45 }
 0x131   :  { %v384_v47 = vpack.c.bf16 %v361_v46, %v361_v46 }
 0x133   :  { %394 = vst.msk [vmem:[%s737_s5] sm:$0xf] %vm393_vm3, %v384_v47 }
 0x134   :  { %v329_v48 = vpop.f32.mrf.mxu2  ;;  %v362_v49 = vpop.f32.mrf.mxu3 }
 0x135   :  { %v330_v50 = vadd.f32 %v538_v42, %v329_v48 }
 0x137   :  { %v363_v51 = vadd.f32 %v362_v49, %v330_v50 }
 0x139   :  { %v385_v52 = vpack.c.bf16 %v363_v51, %v363_v51 }
 0x13b   :  { %395 = vst.msk [vmem:[%s737_s5 + $0x4] sm:$0xf] %vm393_vm3, %v385_v52 }
 0x13c   :  { %v332_v53 = vpop.f32.mrf.mxu2  ;;  %v365_v54 = vpop.f32.mrf.mxu3 }
 0x13d   :  { %v333_v55 = vadd.f32 %v538_v42, %v332_v53 }
 0x13f   :  { %v366_v56 = vadd.f32 %v365_v54, %v333_v55 }
 0x141   :  { %v386_v57 = vpack.c.bf16 %v366_v56, %v366_v56 }
 0x143   :  { %396 = vst.msk [vmem:[%s737_s5 + $0x8] sm:$0xf] %vm393_vm3, %v386_v57 }
 0x144   :  { %v334_v58 = vpop.f32.mrf.mxu2  ;;  %v367_v59 = vpop.f32.mrf.mxu3 }
 0x145   :  { %v335_v60 = vadd.f32 %v538_v42, %v334_v58 }
 0x147   :  { %v368_v61 = vadd.f32 %v367_v59, %v335_v60 }
 0x149   :  { %v387_v62 = vpack.c.bf16 %v368_v61, %v368_v61 }
 0x14b   :  { %397 = vst.msk [vmem:[%s737_s5 + $0xc] sm:$0xf] %vm393_vm3, %v387_v62 }
 0x14c   :  { %v337_v63 = vpop.f32.mrf.mxu2  ;;  %v370_v0 = vpop.f32.mrf.mxu3 }
 0x14d   :  { %v338_v1 = vadd.f32 %v538_v42, %v337_v63 }
 0x14f   :  { %v371_v2 = vadd.f32 %v370_v0, %v338_v1 }
 0x151   :  { %v388_v3 = vpack.c.bf16 %v371_v2, %v371_v2 }
 0x153   :  { %398 = vst.msk [vmem:[%s737_s5 + $0x10] sm:$0xf] %vm393_vm3, %v388_v3 }
 0x154   :  { %v339_v4 = vpop.f32.mrf.mxu2  ;;  %v372_v5 = vpop.f32.mrf.mxu3 }
 0x155   :  { %v340_v6 = vadd.f32 %v538_v42, %v339_v4 }
 0x157   :  { %v373_v7 = vadd.f32 %v372_v5, %v340_v6 }
 0x159   :  { %v389_v8 = vpack.c.bf16 %v373_v7, %v373_v7 }
 0x15b   :  { %399 = vst.msk [vmem:[%s737_s5 + $0x14] sm:$0xf] %vm393_vm3, %v389_v8 }
 0x15c   :  { %v342_v9 = vpop.f32.mrf.mxu2  ;;  %v375_v10 = vpop.f32.mrf.mxu3 }
 0x15d   :  { %v343_v11 = vadd.f32 %v538_v42, %v342_v9 }
 0x15f   :  { %v376_v12 = vadd.f32 %v375_v10, %v343_v11 }
 0x161   :  { %v390_v13 = vpack.c.bf16 %v376_v12, %v376_v12 }
 0x163   :  { %400 = vst.msk [vmem:[%s737_s5 + $0x18] sm:$0xf] %vm393_vm3, %v390_v13 }
 0x164   :  { %v344_v14 = vpop.f32.mrf.mxu2  ;;  %v377_v15 = vpop.f32.mrf.mxu3 }
 0x165   :  { %v345_v16 = vadd.f32 %v538_v42, %v344_v14 }
 0x167   :  { %v378_v17 = vadd.f32 %v377_v15, %v345_v16 }
 0x169   :  { %v391_v18 = vpack.c.bf16 %v378_v17, %v378_v17 }
 0x16b   :  { %401 = vst.msk [vmem:[%s737_s5 + $0x1c] sm:$0xf] %vm393_vm3, %v391_v18 }
 0x16c   :  { %v347_v19 = vpop.f32.mrf.mxu2  ;;  %v380_v20 = vpop.f32.mrf.mxu3 }
 0x16d   :  { %v348_v21 = vadd.f32 %v538_v42, %v347_v19 }
 0x16f   :  { %v381_v22 = vadd.f32 %v380_v20, %v348_v21 }
 0x171   :  { %v392_v23 = vpack.c.bf16 %v381_v22, %v381_v22 }
 0x173   :  { %402 = vst.msk [vmem:[%s737_s5 + $0x20] sm:$0xf] %vm393_vm3, %v392_v23 }
 0x174   :  { %v349_v24 = vpop.f32.mrf.mxu2  ;;  %v382_v25 = vpop.f32.mrf.mxu3 }

// kernel: simple_conv_forward.3
= control target key start
LH: loop header
LB: loop body
LE: loop exit
PB: predicated region body
PF: predicated region fallthrough
CT: control target
= control target key end

     0   :  { %s1390_s0 = inlined_call_operand.vmem [shape: bf16[2,1152], index: 0, kind: input, shape index: {}]   ;;  %s1391_s1 = inlined_call_operand.vmem [shape: bf16[1152,128], index: 1, kind: input, shape index: {}]   ;;  %s1392_s2 = inlined_call_operand.vmem [shape: f32[1,128], index: 2, kind: input, shape index: {}]   ;;  %s1393_s3 = inlined_call_operand.hbm [shape: f32[2,128], index: 3, kind: output, shape index: {}]  }
   0x1   :  { %v1048_v0 = vld [vmem:[%s1391_s1 + $0x38] sm:$0xff]  ;;  %v1047_v4 = vld [vmem:[%s1391_s1 + $0x30] sm:$0xff]  ;;  %v1046_v8 = vld [vmem:[%s1391_s1 + $0x28] sm:$0xff] }
   0x2   :  { %v1064_v1 = vld [vmem:[%s1391_s1 + $0xb8] sm:$0xff]  ;;  %619 = vmatpush.bf16.msra.mxu0 %v1048_v0  ;;  %v1063_v5 = vld [vmem:[%s1391_s1 + $0xb0] sm:$0xff]  ;;  %v1062_v9 = vld [vmem:[%s1391_s1 + $0xa8] sm:$0xff] }
   0x3   :  { %v1072_v2 = vld [vmem:[%s1391_s1 + $0xf8] sm:$0xff]  ;;  %645 = vmatpush.bf16.msra.mxu2 %v1064_v1  ;;  %v1071_v6 = vld [vmem:[%s1391_s1 + $0xf0] sm:$0xff]  ;;  %v1070_v10 = vld [vmem:[%s1391_s1 + $0xe8] sm:$0xff] }
   0x4   :  { %v1056_v3 = vld [vmem:[%s1391_s1 + $0x78] sm:$0xff]  ;;  %658 = vmatpush.bf16.msra.mxu3 %v1072_v2  ;;  %v1055_v7 = vld [vmem:[%s1391_s1 + $0x70] sm:$0xff]  ;;  %v1054_v11 = vld [vmem:[%s1391_s1 + $0x68] sm:$0xff] }
   0x5   :  { %632 = vmatpush.bf16.msra.mxu1 %v1056_v3  ;;  %v1045_v12 = vld [vmem:[%s1391_s1 + $0x20] sm:$0xff]  ;;  %v1044_v16 = vld [vmem:[%s1391_s1 + $0x18] sm:$0xff]  ;;  %v1043_v21 = vld [vmem:[%s1391_s1 + $0x10] sm:$0xff] }
   0x6   :  { %620 = vmatpush.bf16.msra.mxu0 %v1047_v4  ;;  %v1061_v13 = vld [vmem:[%s1391_s1 + $0xa0] sm:$0xff]  ;;  %v1060_v17 = vld [vmem:[%s1391_s1 + $0x98] sm:$0xff]  ;;  %v1059_v22 = vld [vmem:[%s1391_s1 + $0x90] sm:$0xff] }
   0x7   :  { %646 = vmatpush.bf16.msra.mxu2 %v1063_v5  ;;  %v1069_v14 = vld [vmem:[%s1391_s1 + $0xe0] sm:$0xff]  ;;  %v1068_v18 = vld [vmem:[%s1391_s1 + $0xd8] sm:$0xff] }
   0x8   :  { %659 = vmatpush.bf16.msra.mxu3 %v1071_v6  ;;  %v1053_v15 = vld [vmem:[%s1391_s1 + $0x60] sm:$0xff]  ;;  %v1052_v19 = vld [vmem:[%s1391_s1 + $0x58] sm:$0xff] }
   0x9   :  { %633 = vmatpush.bf16.msra.mxu1 %v1055_v7  ;;  %v15_v20 = vld [vmem:[%s1390_s0] sm:$0xff] }
   0xa   :  { %621 = vmatpush.bf16.msra.mxu0 %v1046_v8  ;;  %166 = vst [vmem:[#allocation1] ss:$9 sm:$0xff] %v15_v20 }
   0xb   :  { %647 = vmatpush.bf16.msra.mxu2 %v1062_v9 }
   0xc   :  { %660 = vmatpush.bf16.msra.mxu3 %v1070_v10 }
   0xd   :  { %634 = vmatpush.bf16.msra.mxu1 %v1054_v11 }
   0xe   :  { %622 = vmatpush.bf16.msra.mxu0 %v1045_v12 }
   0xf   :  { %648 = vmatpush.bf16.msra.mxu2 %v1061_v13 }
  0x10   :  { %661 = vmatpush.bf16.msra.mxu3 %v1069_v14 }
  0x11   :  { %635 = vmatpush.bf16.msra.mxu1 %v1053_v15 }
  0x12   :  { %623 = vmatpush.bf16.msra.mxu0 %v1044_v16 }
  0x13   :  { %649 = vmatpush.bf16.msra.mxu2 %v1060_v17 }
  0x14   :  { %8 = vsyncpa [#allocation3], 0  ;;  %662 = vmatpush.bf16.msra.mxu3 %v1068_v18  ;;  %v1067_v23 = vld [vmem:[%s1391_s1 + $0xd0] sm:$0xff]  ;;  %v1042_v25 = vld [vmem:[%s1391_s1 + $0x8] sm:$0xff] }
  0x15   :  { %636 = vmatpush.bf16.msra.mxu1 %v1052_v19  ;;  %v1051_v24 = vld [vmem:[%s1391_s1 + $0x50] sm:$0xff]  ;;  %v1058_v26 = vld [vmem:[%s1391_s1 + $0x88] sm:$0xff]  ;;  %v1041_v29 = vld [vmem:[%s1391_s1] sm:$0xff] }
  0x16   :  { %624 = vmatpush.bf16.msra.mxu0 %v1043_v21  ;;  %v1066_v27 = vld [vmem:[%s1391_s1 + $0xc8] sm:$0xff]  ;;  %v1057_v30 = vld [vmem:[%s1391_s1 + $0x80] sm:$0xff]  ;;  %v1080_v31 = vld [vmem:[%s1391_s1 + $0x138] sm:$0xff] }
  0x17   :  { %650 = vmatpush.bf16.msra.mxu2 %v1059_v22  ;;  %v1050_v28 = vld [vmem:[%s1391_s1 + $0x48] sm:$0xff]  ;;  %v1096_v32 = vld [vmem:[%s1391_s1 + $0x1b8] sm:$0xff]  ;;  %v1065_v33 = vld [vmem:[%s1391_s1 + $0xc0] sm:$0xff] }
  0x18   :  { %663 = vmatpush.bf16.msra.mxu3 %v1067_v23  ;;  %v1049_v34 = vld [vmem:[%s1391_s1 + $0x40] sm:$0xff]  ;;  %v1104_v35 = vld [vmem:[%s1391_s1 + $0x1f8] sm:$0xff]  ;;  %v1079_v37 = vld [vmem:[%s1391_s1 + $0x130] sm:$0xff] }
  0x19   :  { %637 = vmatpush.bf16.msra.mxu1 %v1051_v24  ;;  %v1088_v36 = vld [vmem:[%s1391_s1 + $0x178] sm:$0xff]  ;;  %v1095_v38 = vld [vmem:[%s1391_s1 + $0x1b0] sm:$0xff]  ;;  %v167_v40 = vld [vmem:[#allocation1] sm:$0xff] }
  0x1a   :  { %625 = vmatpush.bf16.msra.mxu0 %v1042_v25  ;;  %v169_v39 = vld [vmem:[#allocation1 + $0x12] sm:$0xff]  ;;  %v170_v43 = vld [vmem:[#allocation1 + $0x1b] sm:$0xff]  ;;  %v168_v44 = vld [vmem:[#allocation1 + $0x9] sm:$0xff] }
  0x1b   :  { %651 = vmatpush.bf16.msra.mxu2 %v1058_v26  ;;  %v1103_v41 = vld [vmem:[%s1391_s1 + $0x1f0] sm:$0xff]  ;;  %v1078_v45 = vld [vmem:[%s1391_s1 + $0x128] sm:$0xff]  ;;  %v174_v49 = vld [vmem:[#allocation1 + $0x3f] sm:$0xff] }
  0x1c   :  { %664 = vmatpush.bf16.msra.mxu3 %v1066_v27  ;;  %v1087_v42 = vld [vmem:[%s1391_s1 + $0x170] sm:$0xff]  ;;  %v1094_v46 = vld [vmem:[%s1391_s1 + $0x1a8] sm:$0xff]  ;;  %v1077_v54 = vld [vmem:[%s1391_s1 + $0x120] sm:$0xff] }
  0x1d   :  { %638 = vmatpush.bf16.msra.mxu1 %v1050_v28  ;;  %v173_v47 = vld [vmem:[#allocation1 + $0x36] sm:$0xff]  ;;  %v171_v48 = vld [vmem:[#allocation1 + $0x24] sm:$0xff]  ;;  %v172_v51 = vld [vmem:[#allocation1 + $0x2d] sm:$0xff] }
  0x1e   :  { %626 = vmatpush.bf16.msra.mxu0 %v1041_v29  ;;  %v16_v50 = vld [vmem:[%s1390_s0 + $0x8] sm:$0x1]  ;;  %v1093_v55 = vld [vmem:[%s1391_s1 + $0x1a0] sm:$0xff]  ;;  %v1076_v58 = vld [vmem:[%s1391_s1 + $0x118] sm:$0xff] }
  0x1f   :  { %652 = vmatpush.bf16.msra.mxu2 %v1057_v30  ;;  %v1102_v52 = vld [vmem:[%s1391_s1 + $0x1e8] sm:$0xff]  ;;  %176 = vst [vmem:[#allocation1] ss:$9 sm:$0xff] %v16_v50  ;;  %v1101_v56 = vld [vmem:[%s1391_s1 + $0x1e0] sm:$0xff]  ;;  %v1092_v59 = vld [vmem:[%s1391_s1 + $0x198] sm:$0xff] }
  0x20   :  { %665 = vmatpush.bf16.msra.mxu3 %v1065_v33  ;;  %v1086_v53 = vld [vmem:[%s1391_s1 + $0x168] sm:$0xff]  ;;  %v1085_v57 = vld [vmem:[%s1391_s1 + $0x160] sm:$0xff]  ;;  %v1100_v60 = vld [vmem:[%s1391_s1 + $0x1d8] sm:$0xff] }
  0x21   :  { %639 = vmatpush.bf16.msra.mxu1 %v1049_v34  ;;  %627 = vmatmul.bf16.vlgmr.msra.gmra.mxu0 %v167_v40  ;;  %v1084_v61 = vld [vmem:[%s1391_s1 + $0x158] sm:$0xff]  ;;  %v1075_v62 = vld [vmem:[%s1391_s1 + $0x110] sm:$0xff]  ;;  %v1074_v2 = vld [vmem:[%s1391_s1 + $0x108] sm:$0xff] }
  0x22   :  { %671 = vmatpush.bf16.msrb.mxu0 %v1080_v31  ;;  %653 = vmatmul.bf16.vlgmr.msra.gmra.mxu2 %v169_v39  ;;  %v1091_v63 = vld [vmem:[%s1391_s1 + $0x190] sm:$0xff]  ;;  %v1090_v3 = vld [vmem:[%s1391_s1 + $0x188] sm:$0xff]  ;;  %v1073_v6 = vld [vmem:[%s1391_s1 + $0x100] sm:$0xff] }
  0x23   :  { %697 = vmatpush.bf16.msrb.mxu2 %v1096_v32  ;;  %666 = vmatmul.bf16.vlgmr.msra.gmra.mxu3 %v170_v43  ;;  %v1099_v0 = vld [vmem:[%s1391_s1 + $0x1d0] sm:$0xff]  ;;  %v1098_v4 = vld [vmem:[%s1391_s1 + $0x1c8] sm:$0xff]  ;;  %v1089_v7 = vld [vmem:[%s1391_s1 + $0x180] sm:$0xff] }
  0x24   :  { %710 = vmatpush.bf16.msrb.mxu3 %v1104_v35  ;;  %640 = vmatmul.bf16.vlgmr.msra.gmra.mxu1 %v168_v44  ;;  %v1083_v1 = vld [vmem:[%s1391_s1 + $0x150] sm:$0xff]  ;;  %v1082_v5 = vld [vmem:[%s1391_s1 + $0x148] sm:$0xff]  ;;  %v1112_v8 = vld [vmem:[%s1391_s1 + $0x238] sm:$0xff] }
  0x25   :  { %684 = vmatpush.bf16.msrb.mxu1 %v1088_v36  ;;  %v1097_v9 = vld [vmem:[%s1391_s1 + $0x1c0] sm:$0xff]  ;;  %v1111_v11 = vld [vmem:[%s1391_s1 + $0x230] sm:$0xff]  ;;  %v1110_v12 = vld [vmem:[%s1391_s1 + $0x228] sm:$0xff] }
  0x26   :  { %672 = vmatpush.bf16.msrb.mxu0 %v1079_v37  ;;  %v1081_v10 = vld [vmem:[%s1391_s1 + $0x140] sm:$0xff]  ;;  %v1108_v14 = vld [vmem:[%s1391_s1 + $0x218] sm:$0xff]  ;;  %v1107_v15 = vld [vmem:[%s1391_s1 + $0x210] sm:$0xff] }
  0x27   :  { %698 = vmatpush.bf16.msrb.mxu2 %v1095_v38  ;;  %v1109_v13 = vld [vmem:[%s1391_s1 + $0x220] sm:$0xff]  ;;  %v1106_v16 = vld [vmem:[%s1391_s1 + $0x208] sm:$0xff] }
  0x28   :  { %711 = vmatpush.bf16.msrb.mxu3 %v1103_v41  ;;  %v1105_v17 = vld [vmem:[%s1391_s1 + $0x200] sm:$0xff]  ;;  %s1141_s1 = smov [#allocation2]  }
  0x29   :  { %685 = vmatpush.bf16.msrb.mxu1 %v1087_v42  ;;  %v177_v18 = vld [vmem:[#allocation1] sm:$0xff]  ;;  %s742_s25 = sshll.u32 %s1141_s1, 4  ;;  %s743_s25 = int_to_ptr.vmem [resolvable:$true] %s742_s25 }
  0x2a   :  { %673 = vmatpush.bf16.msrb.mxu0 %v1078_v45  ;;  %v1114_v27 = vld [vmem:[%s1392_s2] ss:$0 sm:$0xff]  ;;  %s744_s2 = sshll.u32 %s1393_s3, 4  ;;  %s745_s2 = int_to_ptr.hbm [resolvable:$true] %s744_s2 }
  0x2b   :  { %699 = vmatpush.bf16.msrb.mxu2 %v1094_v46 }
  0x2c   :  { %712 = vmatpush.bf16.msrb.mxu3 %v1102_v52 }
  0x2d   :  { %686 = vmatpush.bf16.msrb.mxu1 %v1086_v53 }
  0x2e   :  { %674 = vmatpush.bf16.msrb.mxu0 %v1077_v54 }
  0x2f   :  { %700 = vmatpush.bf16.msrb.mxu2 %v1093_v55 }
  0x30   :  { %713 = vmatpush.bf16.msrb.mxu3 %v1101_v56 }
  0x31   :  { %687 = vmatpush.bf16.msrb.mxu1 %v1085_v57 }
  0x32   :  { %675 = vmatpush.bf16.msrb.mxu0 %v1076_v58 }
  0x33   :  { %701 = vmatpush.bf16.msrb.mxu2 %v1092_v59 }
  0x34   :  { %714 = vmatpush.bf16.msrb.mxu3 %v1100_v60 }
  0x35   :  { %688 = vmatpush.bf16.msrb.mxu1 %v1084_v61 }
  0x36   :  { %676 = vmatpush.bf16.msrb.mxu0 %v1075_v62 }
  0x37   :  { %702 = vmatpush.bf16.msrb.mxu2 %v1091_v63 }
  0x38   :  { %715 = vmatpush.bf16.msrb.mxu3 %v1099_v0 }
  0x39   :  { %689 = vmatpush.bf16.msrb.mxu1 %v1083_v1 }
  0x3a   :  { %677 = vmatpush.bf16.msrb.mxu0 %v1074_v2 }
  0x3b   :  { %703 = vmatpush.bf16.msrb.mxu2 %v1090_v3 }
  0x3c   :  { %716 = vmatpush.bf16.msrb.mxu3 %v1098_v4 }
  0x3d   :  { %690 = vmatpush.bf16.msrb.mxu1 %v1082_v5 }
  0x3e   :  { %678 = vmatpush.bf16.msrb.mxu0 %v1073_v6 }
  0x3f   :  { %704 = vmatpush.bf16.msrb.mxu2 %v1089_v7 }
  0x40   :  { %717 = vmatpush.bf16.msrb.mxu3 %v1097_v9 }
  0x41   :  { %691 = vmatpush.bf16.msrb.mxu1 %v1081_v10  ;;  %679 = vmatmul.bf16.vlgmr.msrb.gmra.mxu0 %v171_v48 }
  0x42   :  { %723 = vmatpush.bf16.msra.mxu0 %v1112_v8  ;;  %705 = vmatmul.bf16.vlgmr.msrb.gmra.mxu2 %v173_v47 }
  0x43   :  { %718 = vmatmul.bf16.vlgmr.msrb.gmra.mxu3 %v174_v49 }
  0x44   :  { %692 = vmatmul.bf16.vlgmr.msrb.gmra.mxu1 %v172_v51 }
  0x46   :  { %724 = vmatpush.bf16.msra.mxu0 %v1111_v11 }
  0x4a   :  { %725 = vmatpush.bf16.msra.mxu0 %v1110_v12 }
  0x4e   :  { %726 = vmatpush.bf16.msra.mxu0 %v1109_v13 }
  0x52   :  { %727 = vmatpush.bf16.msra.mxu0 %v1108_v14 }
  0x56   :  { %728 = vmatpush.bf16.msra.mxu0 %v1107_v15 }
  0x5a   :  { %729 = vmatpush.bf16.msra.mxu0 %v1106_v16 }
  0x5e   :  { %730 = vmatpush.bf16.msra.mxu0 %v1105_v17 }
  0x61   :  { %731 = vmatmul.bf16.vlgmr.msra.gmra.mxu0 %v177_v18 }
  0x9e   :  { %v628_v19 = vpop.f32.mrf.mxu0 }
  0x9f   :  { %v629_v28 = vadd.f32 %v1114_v27, %v628_v19 }
  0xa1   :  { %v641_v20 = vpop.f32.mrf.mxu1 }
  0xa2   :  { %v642_v31 = vadd.f32 %v641_v20, %v629_v28 }
  0xa5   :  { %v654_v21 = vpop.f32.mrf.mxu2 }
  0xa6   :  { %v667_v22 = vpop.f32.mrf.mxu3  ;;  %v630_v23 = vpop.f32.mrf.mxu0  ;;  %v655_v33 = vadd.f32 %v654_v21, %v642_v31 }
  0xa8   :  { %v668_v37 = vadd.f32 %v667_v22, %v655_v33 }
  0xa9   :  { %v643_v24 = vpop.f32.mrf.mxu1 }
  0xad   :  { %v656_v25 = vpop.f32.mrf.mxu2 }
  0xae   :  { %v669_v26 = vpop.f32.mrf.mxu3 }
  0xbe   :  { %v680_v29 = vpop.f32.mrf.mxu0 }
  0xbf   :  { %v681_v39 = vadd.f32 %v680_v29, %v668_v37 }
  0xc1   :  { %v693_v30 = vpop.f32.mrf.mxu1 }
  0xc2   :  { %v694_v41 = vadd.f32 %v693_v30, %v681_v39 }
  0xc5   :  { %v706_v32 = vpop.f32.mrf.mxu2 }
  0xc6   :  { %v719_v34 = vpop.f32.mrf.mxu3  ;;  %v682_v35 = vpop.f32.mrf.mxu0  ;;  %v707_v42 = vadd.f32 %v706_v32, %v694_v41 }
  0xc8   :  { %v720_v43 = vadd.f32 %v719_v34, %v707_v42 }
  0xc9   :  { %v695_v36 = vpop.f32.mrf.mxu1 }
  0xcd   :  { %v708_v38 = vpop.f32.mrf.mxu2 }
  0xce   :  { %v721_v40 = vpop.f32.mrf.mxu3 }
  0xde   :  { %v732_v44 = vpop.f32.mrf.mxu0 }
  0xdf   :  { %v733_v45 = vadd.f32 %v732_v44, %v720_v43 }
  0xe1   :  { %736 = vst [vmem:[#allocation2] sm:$0x3] %v733_v45 }
  0xe2   :  { %747 = dma.vmem_to_hbm [thread:$0]  %s743_s25, 32, %s745_s2, [#allocation3]  }
  0xe6   :  { %v734_v46 = vpop.f32.mrf.mxu0 }
  0xe7   :  { %1139 = dma.done.wait [#allocation3], 32  }
  0xe8   :  { %1140 = vsyncadd [#allocation3], 4294967264 }
  0xe9   :  { %752 = vsyncpa [#allocation3], 1 }

</bundles_post_ra>
